<compile_context>
chip_gen: v6e
topology: v6e:2x2x1
jax: 0.10.0
libtpu: 0.0.40
codegen_flags: <defaults>
</compile_context>

<pallas_src>
import functools
import numpy as np
import jax
import jax.numpy as jnp
from jax.experimental import pallas as pl
from jax.experimental.pallas import tpu as pltpu

LANE = 128


def _round_up(v, m):
    return (v + m - 1) // m * m


# --------------------------- Kernel A: trend decomposition + gating logits ---------------------------

def _gating_kernel(x_ref, acat_ref, dw_ref, db_ref, sw_ref, sb_ref, wg_ref, bg_ref,
                   logits_ref, *, NB, N, TP):
    """series_decomp_multi trend + trend_decompose + start_linear + w_gate, fused.

    x_ref    : (NB*N, TP)  one zero-padded length-TP series per (b, n) row (x[:, :, :, 0])
    acat_ref : (TP, 3*TP)  three lane-aligned moving-average matrices (zero rows/cols >= T)
    dw/db    : (3,) SMEM   Linear(1, 3) of series_decomp_multi
    sw_ref   : (NB*N, 1)   start_linear weight broadcast per row (start_w[n] for row (b, n))
    sb_ref   : (1,) SMEM   start_linear bias
    wg_ref   : (TP, E)     w_gate weight^T (zero rows >= T), bg_ref: (1, E)
    logits_ref : (NB, E)
    """
    x = x_ref[...]                                                   # (R, TP)
    # one MXU push for all three moving averages; each slice starts on a 128-lane boundary
    ma_all = jnp.dot(x, acat_ref[...], preferred_element_type=jnp.float32)  # (R, 3*TP)
    ma0 = ma_all[:, 0:TP]
    ma1 = ma_all[:, TP:2 * TP]
    ma2 = ma_all[:, 2 * TP:3 * TP]
    # pointwise Linear(1, 3) + softmax over the 3 decomposition scales
    l0 = x * dw_ref[0] + db_ref[0]
    l1 = x * dw_ref[1] + db_ref[1]
    l2 = x * dw_ref[2] + db_ref[2]
    m = jnp.maximum(jnp.maximum(l0, l1), l2)
    e0 = jnp.exp(l0 - m)
    e1 = jnp.exp(l1 - m)
    e2 = jnp.exp(l2 - m)
    trend = (e0 * ma0 + e1 * ma1 + e2 * ma2) / (e0 + e1 + e2)        # exact softmax mix
    new_x = x + trend                                                # trend_decompose: x + trend
    # start_linear over nodes on the VPU (replaces the block-diagonal kron matmul)
    weighted = new_x * sw_ref[...]                                   # (R, TP)
    if N == 1:
        s = weighted + sb_ref[0]                                     # (NB, TP)
    else:
        s = weighted.reshape(NB, N, TP).sum(axis=1) + sb_ref[0]      # (NB, TP)
    # w_gate: (NB, TP) @ (TP, E) + bias ; padded rows of wg are zero so padding never leaks
    logits_ref[...] = (jnp.dot(s, wg_ref[...], preferred_element_type=jnp.float32)
                       + bg_ref[...])


# --------------------------- Kernel B: gated expert matmul + residual ---------------------------

def _moe_combine_kernel(x_ref, w_ref, b_ref, out_ref):
    """out = x + x @ W_gated[b] + b_gated[b] on lane-packed rows.

    x_ref  : (1, TILE_R, L) bf16 row tile (L = 128 lane-packed view when d_model < 128)
    w_ref  : (1, L, L)      bf16 per-batch gated expert weight (block-diagonal when packed)
    b_ref  : (1, 1, L)      f32  per-batch gated expert bias (lane tiled)
    out_ref: (1, TILE_R, L)
    Row-wise op -> a partial trailing tile is safe (masked store, no cross-row mixing).
    """
    x = x_ref[0]                                                     # (TILE_R, L) bf16
    y = jnp.dot(x, w_ref[0], preferred_element_type=jnp.float32)     # f32 accumulate on MXU
    y = y + x.astype(jnp.float32) + b_ref[0]                         # residual + bias in f32
    out_ref[0] = y.astype(out_ref.dtype)


# --------------------------- constants / glue / parameters ---------------------------

@functools.lru_cache(maxsize=None)
def _avg_matrices(T, kernel_sizes=(4, 8, 12)):
    """Replicate-padded AvgPool1d(k, stride=1) trend filters as (T, T) matrices.

    A[s, t] = weight of source sample s for output sample t, so (x @ A) is the moving avg.
    # TODO(synk): series_decomp_multi source is not in the spec; even kernels (4, 8, 12) are
    # one sample asymmetric -- this uses front = k-1-(k-1)//2, end = (k-1)//2 replicate padding.
    """
    mats = []
    for k in kernel_sizes:
        front = k - 1 - (k - 1) // 2
        A = np.zeros((T, T), np.float32)
        for t in range(T):
            for j in range(k):
                s = min(max(t + j - front, 0), T - 1)
                A[s, t] += 1.0 / k
        mats.append(A)
    return tuple(mats)


@functools.lru_cache(maxsize=None)
def _avg_cat_padded(T, Tp):
    """Lane-aligned concat: block e occupies columns [e*Tp, e*Tp+T); padding rows/cols are 0."""
    mats = _avg_matrices(T)
    A = np.zeros((Tp, 3 * Tp), np.float32)
    for e, M in enumerate(mats):
        A[:T, e * Tp:e * Tp + T] = M
    return A


def _cv_squared(x):
    eps = 1e-10
    if x.shape[0] == 1:
        return jnp.zeros((), jnp.float32)
    xf = x.astype(jnp.float32)
    return jnp.var(xf, ddof=1) / (jnp.mean(xf) ** 2 + eps)           # torch.var is unbiased


def init_params(key, *, input_size, num_nodes, d_model, num_experts):
    ks = jax.random.split(key, 8)
    p = {}
    p["decomp_w"] = 0.1 * jax.random.normal(ks[0], (3,), jnp.float32)    # Linear(1,3).weight[:,0]
    p["decomp_b"] = 0.1 * jax.random.normal(ks[1], (3,), jnp.float32)    # Linear(1,3).bias
    p["start_w"] = 0.5 * jax.random.normal(ks[2], (num_nodes,), jnp.float32)   # Linear(N,1).weight[0]
    p["start_b"] = 0.1 * jax.random.normal(ks[3], (1,), jnp.float32)
    p["gate_w"] = 0.3 * jax.random.normal(ks[4], (input_size, num_experts), jnp.float32)  # w_gate.weight.T
    p["gate_b"] = jnp.zeros((num_experts,), jnp.float32)
    # TODO(synk): Transformer_Layer experts are not defined in the provided source; each expert
    # is stood in by a per-expert dense projection on d_model (shape-preserving).
    p["expert_w"] = 0.2 * jax.random.normal(ks[5], (num_experts, d_model, d_model), jnp.float32)
    p["expert_b"] = 0.1 * jax.random.normal(ks[6], (num_experts, 1, d_model), jnp.float32)
    # w_noise / end_MLP exist in __init__ but are unused in the eval-mode forward pass.
    return p


def ams_forward(x, v_q, params, *, k=2, loss_coef=0.01, out_dtype=jnp.bfloat16):
    # Eval-mode forward (train=False): noisy-gating branch (randn + Normal.cdf load) not taken.
    del v_q  # TODO(synk): v_q feeds the Transformer_Layer attention; unused by stand-in experts.
    B, T, N, D = x.shape
    E = params["expert_w"].shape[0]
    R = B * N
    Tn = T * N
    Tp = _round_up(T, LANE)

    # ---- kernel A: trend decomposition + gating logits (tiled over batch blocks) ----
    x0 = x[:, :, :, 0]                                      # (B, T, N): gating uses channel 0
    x_rows = jnp.transpose(x0, (0, 2, 1)).reshape(R, T).astype(jnp.float32)
    x_rows = jnp.pad(x_rows, ((0, 0), (0, Tp - T)))         # lane-align the time axis
    a_cat = jnp.asarray(_avg_cat_padded(T, Tp))             # (Tp, 3*Tp) cached constant
    sw_rows = jnp.tile(params["start_w"], B).reshape(R, 1)  # start_w[n] per row (b, n)
    gate_w = jnp.pad(params["gate_w"], ((0, Tp - T), (0, 0)))   # zero rows >= T
    gate_b = params["gate_b"].reshape(1, E)

    # batch tile ~2 MiB of rows per grid step; multiple of 8 batches (or full B) for (8,128) rule
    target_batches = max(1, ((2 << 20) // (Tp * 4)) // max(N, 1))
    if target_batches >= B:
        nb = B
    else:
        nb = max(8, (target_batches // 8) * 8)
        if nb >= B:
            nb = B
    gb = pl.cdiv(B, nb)

    xblk_a = nb * N * Tp * 4
    vmem_a = (2 * xblk_a + 2 * Tp * 3 * Tp * 4 + 2 * Tp * max(E, 1) * 4
              + 12 * xblk_a + (1 << 20))
    vmem_a = int(min(max(vmem_a, 16 << 20), 48 << 20))

    logits = pl.pallas_call(
        functools.partial(_gating_kernel, NB=nb, N=N, TP=Tp),
        out_shape=jax.ShapeDtypeStruct((B, E), jnp.float32),
        grid=(gb,),
        in_specs=[
            pl.BlockSpec((nb * N, Tp), lambda i: (i, 0)),            # x rows (batch tile)
            pl.BlockSpec((Tp, 3 * Tp), lambda i: (0, 0)),            # moving-average matrices
            pl.BlockSpec(memory_space=pltpu.MemorySpace.SMEM),       # decomp_w
            pl.BlockSpec(memory_space=pltpu.MemorySpace.SMEM),       # decomp_b
            pl.BlockSpec((nb * N, 1), lambda i: (i, 0)),             # start_w per row
            pl.BlockSpec(memory_space=pltpu.MemorySpace.SMEM),       # start_b
            pl.BlockSpec((Tp, E), lambda i: (0, 0)),                 # gate weight
            pl.BlockSpec((1, E), lambda i: (0, 0)),                  # gate bias
        ],
        out_specs=pl.BlockSpec((nb, E), lambda i: (i, 0)),
        compiler_params=pltpu.CompilerParams(
            dimension_semantics=("parallel",),
            vmem_limit_bytes=vmem_a,
        ),
    )(x_rows, a_cat, params["decomp_w"], params["decomp_b"],
      sw_rows, params["start_b"], gate_w, gate_b)

    # ---- noisy_top_k_gating (eval path): top-k + softmax + scatter (tiny [B,E] glue) ----
    # (left in JAX: E and B are tiny; fusing into kernel A's epilogue is only a latency win)
    kk = min(k + 1, E)
    top_logits, top_idx = jax.lax.top_k(logits, kk)
    top_k_gates = jax.nn.softmax(top_logits[:, :k], axis=1)
    gates = jnp.zeros_like(logits).at[jnp.arange(B)[:, None], top_idx[:, :k]].set(top_k_gates)
    load = (gates > 0).sum(axis=0)
    importance = gates.sum(axis=0)
    balance_loss = (_cv_squared(importance) + _cv_squared(load.astype(jnp.float32))) * loss_coef

    # ---- fold gates into per-batch gated expert weights (tiny einsum in JAX) ----
    # Valid while experts are the linear stand-ins: sum_e g_e (x W_e + b_e) = x (sum_e g_e W_e) + sum_e g_e b_e
    w_gated = jnp.einsum('be,edj->bdj', gates, params["expert_w"])                   # (B, D, D)
    b_gated = jnp.einsum('be,ej->bj', gates, params["expert_b"].reshape(E, D))       # (B, D)

    # lane packing: put P = 128/D rows side by side so kernel-B I/O is fully lane dense
    if D < LANE and LANE % D == 0 and Tn % (LANE // D) == 0:
        P = LANE // D
    else:
        P = 1   # TODO(synk): d_model not dividing 128 falls back to D-wide (partially masked) lanes
    L = P * D
    Rp = Tn // P
    if P > 1:
        eyeP = jnp.eye(P, dtype=jnp.float32)
        w_block = jnp.einsum('pq,bdj->bpdqj', eyeP, w_gated).reshape(B, L, L)  # block-diag kron(I_P, W)
        b_block = jnp.tile(b_gated, (1, P)).reshape(B, 1, L)
    else:
        w_block = w_gated
        b_block = b_gated.reshape(B, 1, L)
    w_block = w_block.astype(jnp.bfloat16)
    b_block = b_block.astype(jnp.float32)

    # bf16 activations for kernel B (halves HBM traffic; upstream activations would already be bf16)
    xf = x.reshape(B, Rp, L).astype(jnp.bfloat16)            # free contiguous reshape + one cast

    # row tile sized by bytes (~1 MiB bf16 per grid step), multiple of 8 sublanes or full Rp
    bytes_per_row = L * 2
    target_rows = max(8, (1 << 20) // bytes_per_row)
    if Rp <= target_rows:
        tile_rp = Rp
    else:
        tile_rp = (target_rows // 8) * 8
    nt = pl.cdiv(Rp, tile_rp)

    out_itemsize = jnp.dtype(out_dtype).itemsize
    vmem_b = (2 * tile_rp * L * 2 + 2 * tile_rp * L * out_itemsize
              + 2 * (L * L * 2 + L * 4)
              + 3 * tile_rp * L * 4
              + (2 << 20))
    vmem_b = int(min(max(vmem_b, 16 << 20), 48 << 20))

    out = pl.pallas_call(
        _moe_combine_kernel,
        out_shape=jax.ShapeDtypeStruct((B, Rp, L), out_dtype),
        grid=(B, nt),
        in_specs=[
            pl.BlockSpec((1, tile_rp, L), lambda b, t: (b, t, 0)),   # lane-dense x row tile
            pl.BlockSpec((1, L, L), lambda b, t: (b, 0, 0)),         # per-batch gated weight (32 KiB)
            pl.BlockSpec((1, 1, L), lambda b, t: (b, 0, 0)),         # per-batch gated bias
        ],
        out_specs=pl.BlockSpec((1, tile_rp, L), lambda b, t: (b, t, 0)),
        compiler_params=pltpu.CompilerParams(
            dimension_semantics=("parallel", "parallel"),            # both TCs on v7x
            vmem_limit_bytes=vmem_b,
        ),
    )(xf, w_block, b_block)

    output = out.reshape(B, T, N, D)                         # pass out_dtype=jnp.float32 for f32 parity
    return output, balance_loss


# --------------------------- pure-JAX reference (same modelling assumptions) ---------------------------

def ams_reference(x, params, *, k=2, loss_coef=0.01):
    B, T, N, D = x.shape
    E = params["expert_w"].shape[0]
    mats = [jnp.asarray(m) for m in _avg_matrices(T)]
    xs = jnp.transpose(x[:, :, :, 0].astype(jnp.float32), (0, 2, 1))         # (B, N, T)
    mas = jnp.stack([xs @ m for m in mats], axis=-1)                          # (B, N, T, 3)
    lg = xs[..., None] * params["decomp_w"] + params["decomp_b"]
    trend = (mas * jax.nn.softmax(lg, axis=-1)).sum(-1)
    new_x = xs + trend
    s = jnp.einsum('bnt,n->bt', new_x, params["start_w"]) + params["start_b"][0]
    logits = s @ params["gate_w"] + params["gate_b"]
    kk = min(k + 1, E)
    top_logits, top_idx = jax.lax.top_k(logits, kk)
    top_k_gates = jax.nn.softmax(top_logits[:, :k], axis=1)
    gates = jnp.zeros_like(logits).at[jnp.arange(B)[:, None], top_idx[:, :k]].set(top_k_gates)
    w_gated = jnp.einsum('be,edj->bdj', gates, params["expert_w"])
    b_gated = jnp.einsum('be,ej->bj', gates, params["expert_b"].reshape(E, D))
    y = jnp.einsum('btnd,bdj->btnj', x.astype(jnp.float32), w_gated) + b_gated[:, None, None, :]
    out = x.astype(jnp.float32) + y
    load = (gates > 0).sum(axis=0).astype(jnp.float32)
    importance = gates.sum(axis=0)
    loss = (_cv_squared(importance) + _cv_squared(load)) * loss_coef
    return out, loss


if __name__ == "__main__":
    B, T, N, D, E, K = 2, 16, 1, 32, 4, 2   # input_size=16, num_nodes=1, d_model=32, 4 experts, k=2
    key = jax.random.PRNGKey(0)
    kx, kv, kp = jax.random.split(key, 3)
    x = jax.random.normal(kx, (B, T, N, D), jnp.float32)
    v_q = jax.random.normal(kv, (B, D), jnp.float32)
    params = init_params(kp, input_size=T, num_nodes=N, d_model=D, num_experts=E)

    out, loss = ams_forward(x, v_q, params, k=K, loss_coef=0.01)
    jax.block_until_ready(out)
    jax.block_until_ready(loss)
    assert out.shape == (B, T, N, D)

    ref_out, ref_loss = ams_reference(x, params, k=K, loss_coef=0.01)
    np.testing.assert_allclose(np.asarray(out.astype(jnp.float32)), np.asarray(ref_out),
                               rtol=5e-2, atol=8e-2)
    np.testing.assert_allclose(np.asarray(loss), np.asarray(ref_loss), rtol=1e-3, atol=1e-4)
    print("KERNEL_OK")
</pallas_src>

<mosaic_0001>
module attributes {stable_mosaic.version = 11 : i64} {
  func.func @_gating_kernel(%arg0: i32, %arg1: memref<2x128xf32, #tpu.memory_space<vmem>>, %arg2: memref<128x384xf32, #tpu.memory_space<vmem>>, %arg3: memref<3xf32, #tpu.memory_space<smem>>, %arg4: memref<3xf32, #tpu.memory_space<smem>>, %arg5: memref<2x1xf32, #tpu.memory_space<vmem>>, %arg6: memref<1xf32, #tpu.memory_space<smem>>, %arg7: memref<128x4xf32, #tpu.memory_space<vmem>>, %arg8: memref<1x4xf32, #tpu.memory_space<vmem>>, %arg9: memref<2x4xf32, #tpu.memory_space<vmem>>) attributes {dimension_semantics = [#tpu.dimension_semantics<parallel>], iteration_bounds = array<i64: 1>, scalar_prefetch = 0 : i64, scratch_operands = 0 : i64, tpu.core_type = #tpu.core_type<tc>, window_params = [{transform_indices = @transform_0, window_bounds = array<i64: 2, 128>}, {pipeline_mode = #tpu.pipeline_mode<synchronous>, transform_indices = @transform_1, window_bounds = array<i64: 128, 384>}, {transform_indices = @transform_2, window_bounds = array<i64: 3>}, {transform_indices = @transform_3, window_bounds = array<i64: 3>}, {transform_indices = @transform_4, window_bounds = array<i64: 2, 1>}, {transform_indices = @transform_5, window_bounds = array<i64: 1>}, {pipeline_mode = #tpu.pipeline_mode<synchronous>, transform_indices = @transform_6, window_bounds = array<i64: 128, 4>}, {pipeline_mode = #tpu.pipeline_mode<synchronous>, transform_indices = @transform_7, window_bounds = array<i64: 1, 4>}, {transform_indices = @transform_8, window_bounds = array<i64: 2, 4>}]} {
    %c0 = arith.constant 0 : index
    %c0_0 = arith.constant 0 : index
    %0 = vector.load %arg1[%c0, %c0_0] : memref<2x128xf32, #tpu.memory_space<vmem>>, vector<2x128xf32>
    %c0_1 = arith.constant 0 : index
    %c0_2 = arith.constant 0 : index
    %1 = vector.load %arg2[%c0_1, %c0_2] : memref<128x384xf32, #tpu.memory_space<vmem>>, vector<128x384xf32>
    %cst = arith.constant dense<0.000000e+00> : vector<2x384xf32>
    %2 = tpu.matmul %0, %1, %cst {dimension_numbers = #tpu.dot_dimension_numbers<[1], [0], [0], [1], [0, 0, 1, 1], [], []>} : vector<2x128xf32>, vector<128x384xf32>, vector<2x384xf32> -> vector<2x384xf32>
    %3 = vector.extract_strided_slice %2 {offsets = [0, 0], sizes = [2, 128], strides = [1, 1]} : vector<2x384xf32> to vector<2x128xf32>
    %4 = vector.extract_strided_slice %2 {offsets = [0, 128], sizes = [2, 128], strides = [1, 1]} : vector<2x384xf32> to vector<2x128xf32>
    %5 = vector.extract_strided_slice %2 {offsets = [0, 256], sizes = [2, 128], strides = [1, 1]} : vector<2x384xf32> to vector<2x128xf32>
    %c0_3 = arith.constant 0 : index
    %6 = memref.load %arg3[%c0_3] : memref<3xf32, #tpu.memory_space<smem>>
    %7 = vector.broadcast %6 : f32 to vector<2x128xf32>
    %8 = arith.mulf %0, %7 : vector<2x128xf32>
    %c0_4 = arith.constant 0 : index
    %9 = memref.load %arg4[%c0_4] : memref<3xf32, #tpu.memory_space<smem>>
    %10 = vector.broadcast %9 : f32 to vector<2x128xf32>
    %11 = arith.addf %8, %10 : vector<2x128xf32>
    %c1 = arith.constant 1 : index
    %12 = memref.load %arg3[%c1] : memref<3xf32, #tpu.memory_space<smem>>
    %13 = vector.broadcast %12 : f32 to vector<2x128xf32>
    %14 = arith.mulf %0, %13 : vector<2x128xf32>
    %c1_5 = arith.constant 1 : index
    %15 = memref.load %arg4[%c1_5] : memref<3xf32, #tpu.memory_space<smem>>
    %16 = vector.broadcast %15 : f32 to vector<2x128xf32>
    %17 = arith.addf %14, %16 : vector<2x128xf32>
    %c2 = arith.constant 2 : index
    %18 = memref.load %arg3[%c2] : memref<3xf32, #tpu.memory_space<smem>>
    %19 = vector.broadcast %18 : f32 to vector<2x128xf32>
    %20 = arith.mulf %0, %19 : vector<2x128xf32>
    %c2_6 = arith.constant 2 : index
    %21 = memref.load %arg4[%c2_6] : memref<3xf32, #tpu.memory_space<smem>>
    %22 = vector.broadcast %21 : f32 to vector<2x128xf32>
    %23 = arith.addf %20, %22 : vector<2x128xf32>
    %24 = arith.maximumf %11, %17 : vector<2x128xf32>
    %25 = arith.maximumf %24, %23 : vector<2x128xf32>
    %26 = arith.subf %11, %25 : vector<2x128xf32>
    %27 = math.exp %26 : vector<2x128xf32>
    %28 = arith.subf %17, %25 : vector<2x128xf32>
    %29 = math.exp %28 : vector<2x128xf32>
    %30 = arith.subf %23, %25 : vector<2x128xf32>
    %31 = math.exp %30 : vector<2x128xf32>
    %32 = arith.mulf %27, %3 : vector<2x128xf32>
    %33 = arith.mulf %29, %4 : vector<2x128xf32>
    %34 = arith.addf %32, %33 : vector<2x128xf32>
    %35 = arith.mulf %31, %5 : vector<2x128xf32>
    %36 = arith.addf %34, %35 : vector<2x128xf32>
    %37 = arith.addf %27, %29 : vector<2x128xf32>
    %38 = arith.addf %37, %31 : vector<2x128xf32>
    %39 = arith.divf %36, %38 : vector<2x128xf32>
    %40 = arith.addf %0, %39 : vector<2x128xf32>
    %c0_7 = arith.constant 0 : index
    %c0_8 = arith.constant 0 : index
    %41 = vector.load %arg5[%c0_7, %c0_8] : memref<2x1xf32, #tpu.memory_space<vmem>>, vector<2x1xf32>
    %42 = vector.broadcast %41 : vector<2x1xf32> to vector<2x128xf32>
    %43 = arith.mulf %40, %42 : vector<2x128xf32>
    %c0_9 = arith.constant 0 : index
    %44 = memref.load %arg6[%c0_9] : memref<1xf32, #tpu.memory_space<smem>>
    %45 = vector.broadcast %44 : f32 to vector<2x128xf32>
    %46 = arith.addf %43, %45 : vector<2x128xf32>
    %c0_10 = arith.constant 0 : index
    %c0_11 = arith.constant 0 : index
    %47 = vector.load %arg7[%c0_10, %c0_11] : memref<128x4xf32, #tpu.memory_space<vmem>>, vector<128x4xf32>
    %cst_12 = arith.constant dense<0.000000e+00> : vector<2x4xf32>
    %48 = tpu.matmul %46, %47, %cst_12 {dimension_numbers = #tpu.dot_dimension_numbers<[1], [0], [0], [1], [0, 0, 1, 1], [], []>} : vector<2x128xf32>, vector<128x4xf32>, vector<2x4xf32> -> vector<2x4xf32>
    %c0_13 = arith.constant 0 : index
    %c0_14 = arith.constant 0 : index
    %49 = vector.load %arg8[%c0_13, %c0_14] : memref<1x4xf32, #tpu.memory_space<vmem>>, vector<1x4xf32>
    %50 = vector.broadcast %49 : vector<1x4xf32> to vector<2x4xf32>
    %51 = arith.addf %48, %50 : vector<2x4xf32>
    %c0_15 = arith.constant 0 : index
    %c0_16 = arith.constant 0 : index
    %52 = vector.load %arg9[%c0_15, %c0_16] : memref<2x4xf32, #tpu.memory_space<vmem>>, vector<2x4xf32>
    tpu.vector_store %arg9[%c0_15, %c0_16], %51 {strides = array<i32>} : memref<2x4xf32, #tpu.memory_space<vmem>>, vector<2x4xf32>,
    return
  }
  func.func @transform_0(%arg0: i32) -> (i32, i32) {
    %c0_i32 = arith.constant 0 : i32
    %c0_i32_0 = arith.constant 0 : i32
    return %arg0, %c0_i32 : i32, i32
  }
  func.func @transform_1(%arg0: i32) -> (i32, i32) {
    %c0_i32 = arith.constant 0 : i32
    %c0_i32_0 = arith.constant 0 : i32
    %c0_i32_1 = arith.constant 0 : i32
    return %c0_i32, %c0_i32_0 : i32, i32
  }
  func.func @transform_2(%arg0: i32) -> i32 {
    %c0_i32 = arith.constant 0 : i32
    %c0_i32_0 = arith.constant 0 : i32
    return %c0_i32 : i32
  }
  func.func @transform_3(%arg0: i32) -> i32 {
    %c0_i32 = arith.constant 0 : i32
    %c0_i32_0 = arith.constant 0 : i32
    return %c0_i32 : i32
  }
  func.func @transform_4(%arg0: i32) -> (i32, i32) {
    %c0_i32 = arith.constant 0 : i32
    %c0_i32_0 = arith.constant 0 : i32
    return %arg0, %c0_i32 : i32, i32
  }
  func.func @transform_5(%arg0: i32) -> i32 {
    %c0_i32 = arith.constant 0 : i32
    %c0_i32_0 = arith.constant 0 : i32
    return %c0_i32 : i32
  }
  func.func @transform_6(%arg0: i32) -> (i32, i32) {
    %c0_i32 = arith.constant 0 : i32
    %c0_i32_0 = arith.constant 0 : i32
    %c0_i32_1 = arith.constant 0 : i32
    return %c0_i32, %c0_i32_0 : i32, i32
  }
  func.func @transform_7(%arg0: i32) -> (i32, i32) {
    %c0_i32 = arith.constant 0 : i32
    %c0_i32_0 = arith.constant 0 : i32
    %c0_i32_1 = arith.constant 0 : i32
    return %c0_i32, %c0_i32_0 : i32, i32
  }
  func.func @transform_8(%arg0: i32) -> (i32, i32) {
    %c0_i32 = arith.constant 0 : i32
    %c0_i32_0 = arith.constant 0 : i32
    return %arg0, %c0_i32 : i32, i32
  }
}

</mosaic_0001>

<bundles_post_ra>
// kernel: tpu_custom_call.1
= control target key start
LH: loop header
LB: loop body
LE: loop exit
PB: predicated region body
PF: predicated region fallthrough
CT: control target
= control target key end

     0   :  { %14 = vsyncpa [#allocation4], 0  ;;  %s789_s0 = inlined_call_operand.vmem [shape: f32[2,128], index: 0, kind: input, shape index: {}]   ;;  %s790_s1 = inlined_call_operand.hbm [shape: f32[128,384], index: 1, kind: input, shape index: {}]   ;;  %s791_s2 = inlined_call_operand.vmem [shape: f32[3], index: 2, kind: input, shape index: {}]   ;;  %s792_s3 = inlined_call_operand.vmem [shape: f32[3], index: 3, kind: input, shape index: {}]   ;;  %s793_s4 = inlined_call_operand.vmem [shape: f32[2,1], index: 4, kind: input, shape index: {}]   ;;  %s794_s5 = inlined_call_operand.<no memory space> [shape: f32[1], index: 5, kind: input, shape index: {}]   ;;  %s795_s6 = inlined_call_operand.vmem [shape: f32[128,4], index: 6, kind: input, shape index: {}]   ;;  %s796_s7 = inlined_call_operand.vmem [shape: f32[1,4], index: 7, kind: input, shape index: {}]   ;;  %s797_s8 = inlined_call_operand.hbm [shape: f32[2,4], index: 8, kind: output, shape index: {}]  }
   0x1   :  { %15 = vsyncpa [#allocation6], 0 }
   0x2   :  { %16 = vsyncpa [#allocation9], 0 }
   0x3   :  { %17 = vsyncpa [#allocation5], 0  ;;  %s620_s27 = smov [#allocation3]   ;;  %s38_s9 = sshll.u32 %s791_s2, 4  ;;  %s39_s9 = int_to_ptr.vmem [resolvable:$true] %s38_s9 }
   0x4   :  { %s25_s28 = sshll.u32 %s620_s27, 4  ;;  %s26_s28 = int_to_ptr.vmem [resolvable:$true] %s25_s28 }
   0x5   :  { %s556_s10 = scalar_lea.vmem %s26_s28, 6144  ;;  %p561_p1 = scmp.lt.s32.totalorder %s26_s28, %s26_s28 }
   0x6   :  { %p557_p0 = scmp.ne.s32.totalorder %s26_s28, %s556_s10  ;;  %p562_p2 = scmp.lt.s32.totalorder %s556_s10, %s556_s10 }
   0x8   :  { %p563_p3 = por %p562_p2, %p561_p1 }
   0xa   :  { %p564_p4 = pnand %p563_p3, %p557_p0 }
   0xc   :  { %567 = shalt.err (!%p564_p4)
}
   0xd   :  { %s621_s11 = smov 384   ;;  %s622_s12 = smov 24  }
   0xe   :  { %31 = dma.hbm_to_vmem [thread:$0]  %s790_s1, 6144, %s26_s28, [#allocation4], %s621_s11, %s621_s11, %s622_s12  }
   0xf   :  { %s568_s15 = scalar_lea.vmem %s39_s9, 16  ;;  %p573_p6 = scmp.lt.s32.totalorder %s39_s9, %s39_s9 }
  0x10   :  { %p569_p5 = scmp.ne.s32.totalorder %s39_s9, %s568_s15  ;;  %p574_p7 = scmp.lt.s32.totalorder %s568_s15, %s568_s15 }
  0x12   :  { %p575_p8 = por %p574_p7, %p573_p6 }
  0x14   :  { %p576_p9 = pnand %p575_p8, %p569_p5 }
  0x16   :  { %579 = shalt.err (!%p576_p9)
}
  0x17   :  { %s623_s2 = smov [#allocation7]   ;;  %s48_s18 = sshll.u32 %s792_s3, 4  ;;  %s49_s18 = int_to_ptr.vmem [resolvable:$true] %s48_s18 }
  0x18   :  { %41 = dma.vmem_to_smem %s39_s9, 16, %s623_s2, [#allocation6]  }
  0x19   :  { %s580_s19 = scalar_lea.vmem %s49_s18, 16  ;;  %p585_p11 = scmp.lt.s32.totalorder %s49_s18, %s49_s18 }
  0x1a   :  { %p581_p10 = scmp.ne.s32.totalorder %s49_s18, %s580_s19  ;;  %p586_p12 = scmp.lt.s32.totalorder %s580_s19, %s580_s19 }
  0x1c   :  { %p587_p13 = por %p586_p12, %p585_p11 }
  0x1e   :  { %p588_p0 = pnand %p587_p13, %p581_p10 }
  0x20   :  { %591 = shalt.err (!%p588_p0)
}
  0x21   :  { %s624_s1 = smov [#allocation8]  }
  0x22   :  { %51 = dma.vmem_to_smem %s49_s18, 16, %s624_s1, [#allocation9]  }
  0x23   :  { %612 = dma.done.wait [#allocation4], 6144  }
  0x24   :  { %613 = vsyncadd [#allocation4], 4294961152 }
  0x25   :  { %614 = dma.done.wait [#allocation6], 16  }
  0x26   :  { %615 = vsyncadd [#allocation6], 4294967280 }
  0x27   :  { %616 = dma.done.wait [#allocation9], 16  }
  0x28   :  { %617 = vsyncadd [#allocation9], 4294967280 }
  0x29   :  { %69 = sfence }
  0x2a   :  { %v117_v0 = vld [vmem:[#allocation3 + $0x170] sm:$0xff]  ;;  %v116_v1 = vld [vmem:[#allocation3 + $0x168] sm:$0xff]  ;;  %v114_v2 = vld [vmem:[#allocation3 + $0x158] sm:$0xff]  ;;  %v625_v3 = vmov 0.0   ;;  %vm626_vm0 = vmmov 0   ;;  %v627_v51 = vmov 0  }
  0x2b   :  { %119 = vmatprep.subr.mxu0 %v117_v0  ;;  %460 = vmatprep.subr.mxu1 %v625_v3  ;;  %v113_v4 = vld [vmem:[#allocation3 + $0x150] sm:$0xff]  ;;  %v118_v5 = vld [vmem:[#allocation3 + $0x178] sm:$0xff]  ;;  %v111_v6 = vld [vmem:[#allocation3 + $0x140] sm:$0xff]  ;;  %s260_s26 = sld [smem:[#allocation7]]  ;;  %s628_s13 = smov [#allocation10]   ;;  %vm402_vm1 = vcmask 25600  }
  0x2c   :  { %120 = vmatpush1.msra.mxu0 %v116_v1  ;;  %461 = vmatpush3.msra.mxu1 %v118_v5  ;;  %v115_v7 = vld [vmem:[#allocation3 + $0x160] sm:$0xff]  ;;  %v110_v8 = vld [vmem:[#allocation3 + $0x138] sm:$0xff]  ;;  %v112_v9 = vld [vmem:[#allocation3 + $0x148] sm:$0xff]  ;;  %s421_s27 = sld [smem:[#allocation7 + $0x1]]  ;;  %s410_s14 = sshll.u32 %s628_s13, 4  ;;  %s411_s14 = int_to_ptr.vmem [resolvable:$true] %s410_s14 }
  0x2d   :  { %121 = vmatprep.subr.mxu0 %v114_v2  ;;  %462 = vmatprep.subr.mxu1 %v625_v3  ;;  %v108_v10 = vld [vmem:[#allocation3 + $0x128] sm:$0xff]  ;;  %v107_v11 = vld [vmem:[#allocation3 + $0x120] sm:$0xff]  ;;  %v109_v12 = vld [vmem:[#allocation3 + $0x130] sm:$0xff]  ;;  %s422_s28 = sld [smem:[#allocation8 + $0x1]]  ;;  %s592_s15 = scalar_lea.vmem %s411_s14, 32 }
  0x2e   :  { %122 = vmatpush1.msra.mxu0 %v113_v4  ;;  %463 = vmatpush3.msra.mxu1 %v115_v7  ;;  %v105_v13 = vld [vmem:[#allocation3 + $0x110] sm:$0xff]  ;;  %v104_v14 = vld [vmem:[#allocation3 + $0x108] sm:$0xff]  ;;  %v106_v15 = vld [vmem:[#allocation3 + $0x118] sm:$0xff]  ;;  %s423_s29 = sld [smem:[#allocation7 + $0x2]]  ;;  %p593_p1 = scmp.ne.s32.totalorder %s411_s14, %s592_s15 }
  0x2f   :  { %123 = vmatprep.subr.mxu0 %v111_v6  ;;  %464 = vmatprep.subr.mxu1 %v625_v3  ;;  %v102_v16 = vld [vmem:[#allocation3 + $0xf8] sm:$0xff]  ;;  %v101_v17 = vld [vmem:[#allocation3 + $0xf0] sm:$0xff]  ;;  %v103_v18 = vld [vmem:[#allocation3 + $0x100] sm:$0xff]  ;;  %s263_s30 = sld [smem:[#allocation8]]  ;;  %p597_p2 = scmp.lt.s32.totalorder %s411_s14, %s411_s14 }
  0x30   :  { %124 = vmatpush1.msra.mxu0 %v110_v8  ;;  %465 = vmatpush3.msra.mxu1 %v112_v9  ;;  %v99_v19 = vld [vmem:[#allocation3 + $0xe0] sm:$0xff]  ;;  %v98_v20 = vld [vmem:[#allocation3 + $0xd8] sm:$0xff]  ;;  %v100_v21 = vld [vmem:[#allocation3 + $0xe8] sm:$0xff]  ;;  %s424_s9 = sld [smem:[#allocation8 + $0x2]]  ;;  %p598_p3 = scmp.lt.s32.totalorder %s592_s15, %s592_s15 }
  0x31   :  { %125 = vmatprep.subr.mxu0 %v108_v10  ;;  %466 = vmatprep.subr.mxu1 %v625_v3  ;;  %v96_v22 = vld [vmem:[#allocation3 + $0xc8] sm:$0xff]  ;;  %v95_v23 = vld [vmem:[#allocation3 + $0xc0] sm:$0xff]  ;;  %v97_v24 = vld [vmem:[#allocation3 + $0xd0] sm:$0xff]  ;;  %v261_v5 = vstv %s260_s26 }
  0x32   :  { %126 = vmatpush1.msra.mxu0 %v107_v11  ;;  %467 = vmatpush3.msra.mxu1 %v109_v12  ;;  %v93_v25 = vld [vmem:[#allocation3 + $0xb0] sm:$0xff]  ;;  %v92_v26 = vld [vmem:[#allocation3 + $0xa8] sm:$0xff]  ;;  %v94_v27 = vld [vmem:[#allocation3 + $0xb8] sm:$0xff]  ;;  %v267_v6 = vstv %s421_s27  ;;  %p599_p4 = por %p598_p3, %p597_p2 }
  0x33   :  { %127 = vmatprep.subr.mxu0 %v105_v13  ;;  %468 = vmatprep.subr.mxu1 %v625_v3  ;;  %v90_v28 = vld [vmem:[#allocation3 + $0x98] sm:$0xff]  ;;  %v89_v29 = vld [vmem:[#allocation3 + $0x90] sm:$0xff]  ;;  %v91_v30 = vld [vmem:[#allocation3 + $0xa0] sm:$0xff]  ;;  %v270_v9 = vstv %s422_s28 }
  0x34   :  { %128 = vmatpush1.msra.mxu0 %v104_v14  ;;  %469 = vmatpush3.msra.mxu1 %v106_v15  ;;  %v87_v31 = vld [vmem:[#allocation3 + $0x80] sm:$0xff]  ;;  %v86_v32 = vld [vmem:[#allocation3 + $0x78] sm:$0xff]  ;;  %v88_v33 = vld [vmem:[#allocation3 + $0x88] sm:$0xff]  ;;  %v273_v10 = vstv %s423_s29  ;;  %p600_p5 = pnand %p599_p4, %p593_p1 }
  0x35   :  { %129 = vmatprep.subr.mxu0 %v102_v16  ;;  %470 = vmatprep.subr.mxu1 %v625_v3  ;;  %v84_v34 = vld [vmem:[#allocation3 + $0x68] sm:$0xff]  ;;  %v83_v35 = vld [vmem:[#allocation3 + $0x60] sm:$0xff]  ;;  %v85_v36 = vld [vmem:[#allocation3 + $0x70] sm:$0xff] }
  0x36   :  { %130 = vmatpush1.msra.mxu0 %v101_v17  ;;  %471 = vmatpush3.msra.mxu1 %v103_v18  ;;  %v81_v37 = vld [vmem:[#allocation3 + $0x50] sm:$0xff]  ;;  %v80_v38 = vld [vmem:[#allocation3 + $0x48] sm:$0xff]  ;;  %v82_v39 = vld [vmem:[#allocation3 + $0x58] sm:$0xff]  ;;  %v276_v14 = vstv %s424_s9 }
  0x37   :  { %131 = vmatprep.subr.mxu0 %v99_v19  ;;  %472 = vmatprep.subr.mxu1 %v625_v3  ;;  %v78_v40 = vld [vmem:[#allocation3 + $0x38] sm:$0xff]  ;;  %v77_v41 = vld [vmem:[#allocation3 + $0x30] sm:$0xff]  ;;  %v79_v42 = vld [vmem:[#allocation3 + $0x40] sm:$0xff] }
  0x38   :  { %132 = vmatpush1.msra.mxu0 %v98_v20  ;;  %473 = vmatpush3.msra.mxu1 %v100_v21  ;;  %v75_v43 = vld [vmem:[#allocation3 + $0x20] sm:$0xff]  ;;  %v74_v44 = vld [vmem:[#allocation3 + $0x18] sm:$0xff]  ;;  %v72_v45 = vld [vmem:[#allocation3 + $0x8] sm:$0xff] }
  0x39   :  { %133 = vmatprep.subr.mxu0 %v96_v22  ;;  %474 = vmatprep.subr.mxu1 %v625_v3  ;;  %v76_v46 = vld [vmem:[#allocation3 + $0x28] sm:$0xff]  ;;  %v71_v47 = vld [vmem:[#allocation3] sm:$0xff]  ;;  %v73_v49 = vld [vmem:[#allocation3 + $0x10] sm:$0xff] }
  0x3a   :  { %134 = vmatpush1.msra.mxu0 %v95_v23  ;;  %475 = vmatpush3.msra.mxu1 %v97_v24  ;;  %v702_v48 = vld [vmem:[%s789_s0] sm:$0x3]  ;;  %v324_v52 = vld [vmem:[%s795_s6 + $0x78] sm:$0xff]  ;;  %v323_v53 = vld [vmem:[%s795_s6 + $0x70] sm:$0xff] }
  0x3b   :  { %135 = vmatprep.subr.mxu0 %v93_v25  ;;  %476 = vmatprep.subr.mxu1 %v625_v3  ;;  %v299_v50 = vld [vmem:[%s793_s4] sm:$0x3]  ;;  %v322_v54 = vld [vmem:[%s795_s6 + $0x68] sm:$0xff]  ;;  %v320_v56 = vld [vmem:[%s795_s6 + $0x58] sm:$0xff]  ;;  %v262_v7 = vmul.f32 %v261_v5, %v702_v48  ;;  %v268_v8 = vmul.f32 %v267_v6, %v702_v48  ;;  %v274_v12 = vmul.f32 %v273_v10, %v702_v48 }
  0x3c   :  { %136 = vmatpush1.msra.mxu0 %v92_v26  ;;  %477 = vmatpush3.msra.mxu1 %v94_v27  ;;  %v321_v55 = vld [vmem:[%s795_s6 + $0x60] sm:$0xff]  ;;  %v319_v57 = vld [vmem:[%s795_s6 + $0x50] sm:$0xff]  ;;  %v318_v58 = vld [vmem:[%s795_s6 + $0x48] sm:$0xff] }
  0x3d   :  { %137 = vmatprep.subr.mxu0 %v90_v28  ;;  %478 = vmatprep.subr.mxu1 %v625_v3  ;;  %v317_v59 = vld [vmem:[%s795_s6 + $0x40] sm:$0xff]  ;;  %v316_v60 = vld [vmem:[%s795_s6 + $0x38] sm:$0xff]  ;;  %v315_v61 = vld [vmem:[%s795_s6 + $0x30] sm:$0xff]  ;;  %v271_v11 = vadd.f32 %v270_v9, %v268_v8  ;;  %v277_v15 = vadd.f32 %v276_v14, %v274_v12 }
  0x3e   :  { %138 = vmatpush1.msra.mxu0 %v89_v29  ;;  %479 = vmatpush3.msra.mxu1 %v91_v30  ;;  %v314_v62 = vld [vmem:[%s795_s6 + $0x28] sm:$0xff]  ;;  %v313_v63 = vld [vmem:[%s795_s6 + $0x20] sm:$0xff]  ;;  %v312_v0 = vld [vmem:[%s795_s6 + $0x18] sm:$0xff] }
  0x3f   :  { %139 = vmatprep.subr.mxu0 %v87_v31  ;;  %480 = vmatprep.subr.mxu1 %v625_v3  ;;  %v311_v1 = vld [vmem:[%s795_s6 + $0x10] sm:$0xff]  ;;  %v310_v2 = vld [vmem:[%s795_s6 + $0x8] sm:$0xff]  ;;  %v309_v4 = vld [vmem:[%s795_s6] sm:$0xff] }
  0x40   :  { %140 = vmatpush1.msra.mxu0 %v86_v32  ;;  %481 = vmatpush3.msra.mxu1 %v88_v33 }
  0x41   :  { %141 = vmatprep.subr.mxu0 %v84_v34  ;;  %482 = vmatprep.subr.mxu1 %v625_v3 }
  0x42   :  { %142 = vmatpush1.msra.mxu0 %v83_v35  ;;  %483 = vmatpush3.msra.mxu1 %v85_v36 }
  0x43   :  { %143 = vmatprep.subr.mxu0 %v81_v37  ;;  %484 = vmatprep.subr.mxu1 %v625_v3 }
  0x44   :  { %144 = vmatpush1.msra.mxu0 %v80_v38  ;;  %485 = vmatpush3.msra.mxu1 %v82_v39 }
  0x45   :  { %145 = vmatprep.subr.mxu0 %v78_v40  ;;  %486 = vmatprep.subr.mxu1 %v625_v3 }
  0x46   :  { %146 = vmatpush1.msra.mxu0 %v77_v41  ;;  %487 = vmatpush3.msra.mxu1 %v79_v42  ;;  %v307_v42 = vstv %s794_s5 }
  0x47   :  { %147 = vmatprep.subr.mxu0 %v75_v43  ;;  %488 = vmatprep.subr.mxu1 %v625_v3 }
  0x48   :  { %148 = vmatpush1.msra.mxu0 %v74_v44  ;;  %183 = vmatprep.mubr.f32.mxu0 %v625_v3 }
  0x49   :  { %149 = vmatprep.subr.mxu0 %v72_v45  ;;  %489 = vmatpush3.msra.mxu1 %v76_v46  ;;  %v425_v45 = vld [vmem:[%s796_s7] ss:$0 sm:$0xff] }
  0x4a   :  { %150 = vmatpush1.msra.mxu0 %v71_v47  ;;  %490 = vmatprep.subr.mxu1 %v625_v3 }
  0x4b   :  { %184 = vmatmul.mubr.f32.vlgmr.msra.gmra.mxu0 %v702_v48  ;;  %491 = vmatpush3.msra.mxu1 %v73_v49 }
  0x4c   :  { %492 = vmatprep.mubr.msk.f32.mxu1 %vm626_vm0, %v625_v3  ;;  %539 = vset.pattern.permute.xlu0 %v627_v51 }
  0x4d   :  { %493 = vmatmul.mubr.f32.vlgmr.msra.gmra.mxu1 %v702_v48  ;;  %302 = vperm.xlu0 %539, %v299_v50  }
  0x4e   :  { %495 = vmatprep.subr.mxu0 %v625_v3  ;;  %527 = vmatprep.mubr.msk.f32.mxu0 %vm626_vm0, %v625_v3 }
  0x4f   :  { %496 = vmatpush3.msra.mxu0 %v324_v52 }
  0x50   :  { %497 = vmatprep.subr.mxu0 %v625_v3 }
  0x51   :  { %498 = vmatpush3.msra.mxu0 %v323_v53 }
  0x52   :  { %499 = vmatprep.subr.mxu0 %v625_v3 }
  0x53   :  { %500 = vmatpush3.msra.mxu0 %v322_v54 }
  0x54   :  { %501 = vmatprep.subr.mxu0 %v625_v3 }
  0x55   :  { %502 = vmatpush3.msra.mxu0 %v321_v55 }
  0x56   :  { %503 = vmatprep.subr.mxu0 %v625_v3 }
  0x57   :  { %504 = vmatpush3.msra.mxu0 %v320_v56 }
  0x58   :  { %505 = vmatprep.subr.mxu0 %v625_v3 }
  0x59   :  { %506 = vmatpush3.msra.mxu0 %v319_v57 }
  0x5a   :  { %507 = vmatprep.subr.mxu0 %v625_v3 }
  0x5b   :  { %508 = vmatpush3.msra.mxu0 %v318_v58 }
  0x5c   :  { %509 = vmatprep.subr.mxu0 %v625_v3 }
  0x5d   :  { %510 = vmatpush3.msra.mxu0 %v317_v59 }
  0x5e   :  { %511 = vmatprep.subr.mxu0 %v625_v3 }
  0x5f   :  { %512 = vmatpush3.msra.mxu0 %v316_v60 }
  0x60   :  { %513 = vmatprep.subr.mxu0 %v625_v3 }
  0x61   :  { %514 = vmatpush3.msra.mxu0 %v315_v61 }
  0x62   :  { %515 = vmatprep.subr.mxu0 %v625_v3 }
  0x63   :  { %516 = vmatpush3.msra.mxu0 %v314_v62 }
  0x64   :  { %517 = vmatprep.subr.mxu0 %v625_v3 }
  0x65   :  { %518 = vmatpush3.msra.mxu0 %v313_v63 }
  0x66   :  { %519 = vmatprep.subr.mxu0 %v625_v3 }
  0x67   :  { %520 = vmatpush3.msra.mxu0 %v312_v0 }
  0x68   :  { %521 = vmatprep.subr.mxu0 %v625_v3 }
  0x69   :  { %522 = vmatpush3.msra.mxu0 %v311_v1 }
  0x6a   :  { %523 = vmatprep.subr.mxu0 %v625_v3 }
  0x6b   :  { %524 = vmatpush3.msra.mxu0 %v310_v2 }
  0x6c   :  { %525 = vmatprep.subr.mxu0 %v625_v3  ;;  %v264_v3 = vstv %s263_s30 }
  0x6d   :  { %526 = vmatpush3.msra.mxu0 %v309_v4  ;;  %v265_v13 = vadd.f32 %v264_v3, %v262_v7 }
  0x6f   :  { %v278_v16 = vmax.f32 %v265_v13, %v271_v11 }
  0x71   :  { %v279_v17 = vmax.f32 %v278_v16, %v277_v15 }
  0x73   :  { %v280_v18 = vsub.f32 %v265_v13, %v279_v17  ;;  %v283_v19 = vsub.f32 %v271_v11, %v279_v17  ;;  %v286_v22 = vsub.f32 %v277_v15, %v279_v17 }
  0x75   :  { %v281_v20 = vmul.f32 1.442695, %v280_v18  ;;  %v284_v21 = vmul.f32 1.442695, %v283_v19  ;;  %v287_v23 = vmul.f32 1.442695, %v286_v22 }
  0x77   :  { %540 = vpow2.f32 %v281_v20 }
  0x78   :  { %542 = vpow2.f32 %v284_v21 }
  0x79   :  { %544 = vpow2.f32 %v287_v23 }
  0x84   :  { %v541_v24 = vpop.eup %540 }
  0x85   :  { %v543_v25 = vpop.eup %542 }
  0x86   :  { %v294_v26 = vadd.f32 %v543_v25, %v541_v24  ;;  %v545_v27 = vpop.eup %544 }
  0x88   :  { %v295_v28 = vadd.f32 %v545_v27, %v294_v26 }
  0x8a   :  { %546 = vrcp.f32 %v295_v28 }
  0x97   :  { %v547_v37 = vpop.eup %546 }
  0xc8   :  { %v303_v40 = vpop.permute.xlu0 %302 }
 0x10b   :  { %v185_v29 = vpop.f32.mrf.mxu0 }
 0x10c   :  { %v289_v32 = vmul.f32 %v541_v24, %v185_v29 }
 0x10d   :  { %v187_v30 = vpop.f32.mrf.mxu0  ;;  %v256_v31 = vpop.f32.mrf.mxu1 }
 0x10e   :  { %v290_v33 = vmul.f32 %v543_v25, %v187_v30  ;;  %v292_v34 = vmul.f32 %v545_v27, %v256_v31 }
 0x10f   :  { %v494_v35 = vpop.f32.mrf.mxu1 }
 0x110   :  { %v291_v36 = vadd.f32 %v290_v33, %v289_v32 }
 0x112   :  { %v293_v38 = vadd.f32 %v292_v34, %v291_v36 }
 0x114   :  { %v297_v39 = vmul.f32 %v547_v37, %v293_v38 }
 0x116   :  { %v298_v41 = vadd.f32 %v297_v39, %v702_v48 }
 0x118   :  { %v305_v43 = vmul.f32 %v303_v40, %v298_v41 }
 0x11a   :  { %v308_v44 = vadd.f32 %v307_v42, %v305_v43 }
 0x11c   :  { %528 = vmatmul.mubr.f32.vlgmr.msra.gmra.mxu0 %v308_v44 }
 0x1dc   :  { %v398_v46 = vpop.f32.mrf.mxu0 }
 0x1dd   :  { %v399_v47 = vadd.f32 %v425_v45, %v398_v46 }
 0x1de   :  { %v529_v49 = vpop.f32.mrf.mxu0 }
 0x1df   :  { %403 = vst.msk [vmem:[#allocation10] sm:$0x3] %vm402_vm1, %v399_v47 }
 0x1e0   :  { %603 = shalt.err (!%p600_p5)
}
 0x1e1   :  { %413 = dma.vmem_to_hbm [thread:$0]  %s411_s14, 32, %s797_s8, [#allocation5]  }
 0x1e2   :  { %618 = dma.done.wait [#allocation5], 32  }
 0x1e3   :  { %619 = vsyncadd [#allocation5], 4294967264 }
 0x1e4   :  { %417 = vsyncpa [#allocation4], 1 }
 0x1e5   :  { %418 = vsyncpa [#allocation5], 1 }
 0x1e6   :  { %419 = vsyncpa [#allocation6], 1 }
 0x1e7   :  { %420 = vsyncpa [#allocation9], 1 }

</bundles_post_ra>
